<compile_context>
chip_gen: v7x
topology: tpu7x:2x2x1
jax: 0.10.0
libtpu: 0.0.40
codegen_flags: <defaults>
</compile_context>

<pallas_src>
import functools

import jax
import jax.numpy as jnp
from jax import lax
from jax.experimental import pallas as pl
from jax.experimental.pallas import tpu as pltpu


def _netvlad_kernel(x_ref, w_ref, b_ref, cent_ref, out_ref, *, use_mxu_agg):
    """Batched NetVLAD for one grid step.

    x_ref    : (TB, C, S)   input descriptors, spatial flattened (S = H*W on lanes)
    w_ref    : (K, C)       conv1x1 weight (= 2*alpha*centroids)
    b_ref    : (K, 1)       conv1x1 bias   (= -alpha * ||centroids||_2)
    cent_ref : (K, C)       centroids
    out_ref  : (TB, K*C)    normalized VLAD descriptors (lane-dense)
    """
    TB, C, S = x_ref.shape
    K = w_ref.shape[0]
    eps = jnp.float32(1e-12)          # F.normalize default eps
    eps2 = jnp.float32(1e-24)         # max(||x||, eps) == sqrt(max(||x||^2, eps^2))

    # --- descriptor-wise L2 normalization over C (sublane reduction) ----------
    x = x_ref[...].astype(jnp.float32)                          # (TB, C, S)
    ssq = jnp.sum(x * x, axis=1, keepdims=True)                 # (TB, 1, S)
    xn = x * lax.rsqrt(jnp.maximum(ssq, eps2))                  # (TB, C, S)

    # --- 1x1 conv: logits[b,k,s] = sum_c w[k,c]*xn[b,c,s] + bias[k] -----------
    w = w_ref[...].astype(jnp.float32)                          # (K, C)
    wb = jnp.broadcast_to(w, (TB, K, C))                        # hoisted broadcast
    logits = jnp.einsum('bkc,bcs->bks', wb, xn,
                        preferred_element_type=jnp.float32)     # (TB, K, S)
    logits = logits + b_ref[...][None, :, :]                    # (1, K, 1) bcast

    # --- softmax over clusters K (sublane axis; S stays on lanes) -------------
    m = jnp.max(logits, axis=1, keepdims=True)                  # (TB, 1, S)
    e = jnp.exp(logits - m)                                     # EUP
    denom = jnp.sum(e, axis=1, keepdims=True)                   # (TB, 1, S)
    r = pl.reciprocal(denom, approx=True)                       # EUP reciprocal
    r = r * (jnp.float32(2.0) - denom * r)                      # 1 Newton step
    a = e * r                                                   # (TB, K, S)

    # --- VLAD aggregation + intra-normalization over C -------------------------
    # vlad[b,k,c] = sum_s a[b,k,s]*xn[b,c,s] - centroids[k,c]*sum_s a[b,k,s]
    if use_mxu_agg:
        # v7x: MRB result path handles many small batched matmuls fine.
        agg = jnp.einsum('bks,bcs->bkc', a, xn,
                         preferred_element_type=jnp.float32)    # (TB, K, C)
        a_sum = jnp.sum(a, axis=-1)                             # (TB, K)
        vlad = agg - cent_ref[...][None, :, :] * a_sum[:, :, None]
        vs = jnp.sum(vlad * vlad, axis=-1, keepdims=True)       # (TB, K, 1)
        vlad = vlad * lax.rsqrt(jnp.maximum(vs, eps2))
        vflat = vlad.reshape(TB, K * C)                         # (TB, K*C)
    else:
        # v5e/v6e: avoid TB serialized MRF drains of sub-vreg matmul results;
        # unroll the K=8 clusters on the VPU/XLU instead.
        cent = cent_ref[...].astype(jnp.float32)                # (K, C)
        pieces = []
        for k in range(K):
            ak = a[:, k:k + 1, :]                               # (TB, 1, S)
            agg_k = jnp.sum(ak * xn, axis=-1)                   # (TB, C)
            asum_k = jnp.sum(ak, axis=-1)                       # (TB, 1)
            vlad_k = agg_k - cent[k:k + 1, :] * asum_k          # (TB, C)
            vs_k = jnp.sum(vlad_k * vlad_k, axis=-1, keepdims=True)
            pieces.append(vlad_k * lax.rsqrt(jnp.maximum(vs_k, eps2)))
        vflat = jnp.concatenate(pieces, axis=-1)                # (TB, K*C)

    # --- global L2 normalization (lane-dense 256-wide) --------------------------
    gs = jnp.sum(vflat * vflat, axis=-1, keepdims=True)
    vflat = vflat * lax.rsqrt(jnp.maximum(gs, eps2))
    out_ref[...] = vflat.astype(out_ref.dtype)


def _tpu_generation():
    """Best-effort TPU generation number from device_kind; None if unknown."""
    try:
        kind = jax.devices()[0].device_kind.lower()
    except Exception:
        return None
    for g in (7, 6, 5, 4, 3, 2):
        if f"v{g}" in kind:
            return g
    return None


def _pick_block_batch(n, gen):
    """Samples per grid step.

    Constraints: TB must divide N, and (TB == N or TB % 8 == 0) so the
    (TB, K*C) output block satisfies the (8, 128) rule.  Caps are VMEM-aware:
    v7x (64 MiB physical) caps at 64 and prefers an even number of grid steps
    for its two TensorCores; v5e/v6e take one big block up to 256.
    """
    if n <= 1:
        return 1
    if gen == 7:
        cap = 64
        cands = [tb for tb in range(8, min(cap, n // 2) + 1, 8)
                 if n % tb == 0 and (n // tb) % 2 == 0]
        if cands:
            return max(cands)
    else:
        cap = 256
    if n <= cap:
        return n
    divs = [tb for tb in range(8, cap + 1, 8) if n % tb == 0]
    if divs:
        return max(divs)
    # TODO(synk): pad the batch for awkward (e.g. prime) N > cap instead of
    # taking one oversized block.
    return n


@functools.partial(jax.jit,
                   static_argnames=("num_clusters", "block_batch", "input_dtype"))
def netvlad_forward(x_nchw, centroids, alpha=100.0, num_clusters=8,
                    block_batch=None, input_dtype=jnp.float32):
    """x_nchw: (N, C, H, W), centroids: (K, C). Returns (N, K*C) float32."""
    N, C, H, W = x_nchw.shape
    K = num_clusters
    S = H * W

    # Free reshape only (no HBM transpose pass): NCHW -> (N, C, S).
    # input_dtype=jnp.bfloat16 narrows the only large HBM operand; math stays f32.
    x = x_nchw.reshape(N, C, S).astype(input_dtype)

    w = (2.0 * alpha * centroids).astype(jnp.float32)                   # (K, C)
    b = (-alpha * jnp.linalg.norm(centroids, axis=1)).reshape(K, 1)
    b = b.astype(jnp.float32)                                           # (K, 1)

    gen = _tpu_generation()
    TB = _pick_block_batch(N, gen) if block_batch is None else block_batch
    G = N // TB

    # MXU batched-einsum aggregation on v7x (MRB) / unknown; VPU loop on v5e/v6e.
    use_mxu_agg = (gen is None) or (gen >= 7)
    vmem_limit = {5: 96, 6: 96, 7: 48}.get(gen, 32) * 1024 * 1024

    kernel = functools.partial(_netvlad_kernel, use_mxu_agg=use_mxu_agg)

    out = pl.pallas_call(
        kernel,
        out_shape=jax.ShapeDtypeStruct((N, K * C), jnp.float32),
        grid_spec=pltpu.PrefetchScalarGridSpec(
            num_scalar_prefetch=0,
            grid=(G,),
            in_specs=[
                pl.BlockSpec((TB, C, S), lambda g: (g, 0, 0)),
                pl.BlockSpec((K, C), lambda g: (0, 0)),
                pl.BlockSpec((K, 1), lambda g: (0, 0)),
                pl.BlockSpec((K, C), lambda g: (0, 0)),
            ],
            out_specs=pl.BlockSpec((TB, K * C), lambda g: (g, 0)),
        ),
        compiler_params=pltpu.CompilerParams(
            dimension_semantics=("parallel",),
            vmem_limit_bytes=vmem_limit),
    )(x, w, b, centroids.astype(jnp.float32))

    return out


def netvlad_reference(x_nchw, centroids, alpha=100.0):
    """Pure-JAX reference mirroring the PyTorch module exactly."""
    eps = 1e-12
    N, C, H, W = x_nchw.shape
    S = H * W

    x = x_nchw.astype(jnp.float32)
    n = jnp.sqrt(jnp.sum(x * x, axis=1, keepdims=True))
    x = x / jnp.maximum(n, eps)                              # normalize over C

    w = 2.0 * alpha * centroids                              # (K, C)
    b = -alpha * jnp.linalg.norm(centroids, axis=1)          # (K,)
    x_flat = x.reshape(N, C, S)                              # (N, C, S)
    logits = jnp.einsum("kc,ncs->nks", w, x_flat) + b[None, :, None]
    a = jax.nn.softmax(logits, axis=1)                       # (N, K, S)

    residual = x_flat[:, None, :, :] - centroids[None, :, :, None]  # (N, K, C, S)
    residual = residual * a[:, :, None, :]
    vlad = jnp.sum(residual, axis=-1)                        # (N, K, C)
    vn = jnp.sqrt(jnp.sum(vlad * vlad, axis=2, keepdims=True))
    vlad = vlad / jnp.maximum(vn, eps)
    vlad = vlad.reshape(N, -1)
    gn = jnp.sqrt(jnp.sum(vlad * vlad, axis=1, keepdims=True))
    vlad = vlad / jnp.maximum(gn, eps)
    return vlad


if __name__ == "__main__":
    # Small, module-consistent shapes: batch=2, dim(C)=32, clusters(K)=8, H=W=8.
    N, C, H, W = 2, 32, 8, 8
    K = 8
    alpha = 100.0

    key = jax.random.PRNGKey(0)
    kx, kc = jax.random.split(key)
    x = jax.random.normal(kx, (N, C, H, W), dtype=jnp.float32)
    centroids = jax.random.uniform(kc, (K, C), dtype=jnp.float32)  # ~ torch.rand

    out = netvlad_forward(x, centroids, alpha=alpha, num_clusters=K)
    out = jax.block_until_ready(out)

    ref = netvlad_reference(x, centroids, alpha=alpha)
    assert out.shape == (N, K * C), out.shape
    max_err = float(jnp.max(jnp.abs(out - ref)))
    assert jnp.allclose(out, ref, atol=1e-4, rtol=1e-3), f"max_err={max_err}"

    print("KERNEL_OK")
</pallas_src>

<mosaic_0001>
module attributes {stable_mosaic.version = 11 : i64} {
  func.func @_netvlad_kernel(%arg0: i32, %arg1: memref<2x32x64xf32, #tpu.memory_space<vmem>>, %arg2: memref<8x32xf32, #tpu.memory_space<vmem>>, %arg3: memref<8x1xf32, #tpu.memory_space<vmem>>, %arg4: memref<8x32xf32, #tpu.memory_space<vmem>>, %arg5: memref<2x256xf32, #tpu.memory_space<vmem>>) attributes {dimension_semantics = [#tpu.dimension_semantics<parallel>], iteration_bounds = array<i64: 1>, scalar_prefetch = 0 : i64, scratch_operands = 0 : i64, tpu.core_type = #tpu.core_type<tc>, window_params = [{transform_indices = @transform_0, window_bounds = array<i64: 2, 32, 64>}, {pipeline_mode = #tpu.pipeline_mode<synchronous>, transform_indices = @transform_1, window_bounds = array<i64: 8, 32>}, {pipeline_mode = #tpu.pipeline_mode<synchronous>, transform_indices = @transform_2, window_bounds = array<i64: 8, 1>}, {pipeline_mode = #tpu.pipeline_mode<synchronous>, transform_indices = @transform_3, window_bounds = array<i64: 8, 32>}, {transform_indices = @transform_4, window_bounds = array<i64: 2, 256>}]} {
    %c0 = arith.constant 0 : index
    %c0_0 = arith.constant 0 : index
    %c0_1 = arith.constant 0 : index
    %0 = vector.load %arg1[%c0, %c0_0, %c0_1] : memref<2x32x64xf32, #tpu.memory_space<vmem>>, vector<2x32x64xf32>
    %1 = arith.mulf %0, %0 : vector<2x32x64xf32>
    %cst = arith.constant dense<0.000000e+00> : vector<2x64xf32>
    %2 = vector.multi_reduction <add>, %1, %cst [1] : vector<2x32x64xf32> to vector<2x64xf32>
    %3 = vector.shape_cast %2 : vector<2x64xf32> to vector<2x1x64xf32>
    %cst_2 = arith.constant 1.000000e-24 : f32
    %4 = vector.broadcast %cst_2 : f32 to vector<2x1x64xf32>
    %5 = arith.maximumf %3, %4 : vector<2x1x64xf32>
    %6 = math.rsqrt %5 : vector<2x1x64xf32>
    %7 = vector.broadcast %6 : vector<2x1x64xf32> to vector<2x32x64xf32>
    %8 = arith.mulf %0, %7 : vector<2x32x64xf32>
    %c0_3 = arith.constant 0 : index
    %c0_4 = arith.constant 0 : index
    %9 = vector.load %arg2[%c0_3, %c0_4] : memref<8x32xf32, #tpu.memory_space<vmem>>, vector<8x32xf32>
    %10 = vector.shape_cast %9 : vector<8x32xf32> to vector<1x8x32xf32>
    %11 = vector.broadcast %10 : vector<1x8x32xf32> to vector<2x8x32xf32>
    "tpu.trace_start"() <{level = 10 : i32, message = "bkc,bcs->bks"}> : () -> ()
    %cst_5 = arith.constant dense<0.000000e+00> : vector<2x8x64xf32>
    %12 = tpu.matmul %11, %8, %cst_5 {dimension_numbers = #tpu.dot_dimension_numbers<[2], [1], [1], [2], [0, 0, 0, 1, 1, 2], [0], [0]>} : vector<2x8x32xf32>, vector<2x32x64xf32>, vector<2x8x64xf32> -> vector<2x8x64xf32>
    "tpu.trace_stop"() : () -> ()
    %c0_6 = arith.constant 0 : index
    %c0_7 = arith.constant 0 : index
    %13 = vector.load %arg3[%c0_6, %c0_7] : memref<8x1xf32, #tpu.memory_space<vmem>>, vector<8x1xf32>
    %14 = vector.shape_cast %13 : vector<8x1xf32> to vector<1x8x1xf32>
    %15 = vector.broadcast %14 : vector<1x8x1xf32> to vector<2x8x64xf32>
    %16 = arith.addf %12, %15 : vector<2x8x64xf32>
    %cst_8 = arith.constant dense<0xFF800000> : vector<2x64xf32>
    %17 = vector.multi_reduction <maximumf>, %16, %cst_8 [1] : vector<2x8x64xf32> to vector<2x64xf32>
    %18 = vector.shape_cast %17 : vector<2x64xf32> to vector<2x1x64xf32>
    %19 = vector.broadcast %18 : vector<2x1x64xf32> to vector<2x8x64xf32>
    %20 = arith.subf %16, %19 : vector<2x8x64xf32>
    %21 = math.exp %20 : vector<2x8x64xf32>
    %cst_9 = arith.constant dense<0.000000e+00> : vector<2x64xf32>
    %22 = vector.multi_reduction <add>, %21, %cst_9 [1] : vector<2x8x64xf32> to vector<2x64xf32>
    %23 = vector.shape_cast %22 : vector<2x64xf32> to vector<2x1x64xf32>
    %24 = tpu.reciprocal %23 {approx = true} : vector<2x1x64xf32> -> vector<2x1x64xf32>
    %25 = arith.mulf %23, %24 : vector<2x1x64xf32>
    %cst_10 = arith.constant 2.000000e+00 : f32
    %26 = vector.broadcast %cst_10 : f32 to vector<2x1x64xf32>
    %27 = arith.subf %26, %25 : vector<2x1x64xf32>
    %28 = arith.mulf %24, %27 : vector<2x1x64xf32>
    %29 = vector.broadcast %28 : vector<2x1x64xf32> to vector<2x8x64xf32>
    %30 = arith.mulf %21, %29 : vector<2x8x64xf32>
    "tpu.trace_start"() <{level = 10 : i32, message = "bks,bcs->bkc"}> : () -> ()
    %cst_11 = arith.constant dense<0.000000e+00> : vector<2x8x32xf32>
    %31 = tpu.matmul %30, %8, %cst_11 {dimension_numbers = #tpu.dot_dimension_numbers<[2], [2], [1], [1], [0, 0, 0, 1, 1, 1], [0], [0]>} : vector<2x8x64xf32>, vector<2x32x64xf32>, vector<2x8x32xf32> -> vector<2x8x32xf32>
    "tpu.trace_stop"() : () -> ()
    %cst_12 = arith.constant dense<0.000000e+00> : vector<2x8xf32>
    %32 = vector.multi_reduction <add>, %30, %cst_12 [2] : vector<2x8x64xf32> to vector<2x8xf32>
    %c0_13 = arith.constant 0 : index
    %c0_14 = arith.constant 0 : index
    %33 = vector.load %arg4[%c0_13, %c0_14] : memref<8x32xf32, #tpu.memory_space<vmem>>, vector<8x32xf32>
    %34 = vector.shape_cast %33 : vector<8x32xf32> to vector<1x8x32xf32>
    %35 = vector.shape_cast %32 : vector<2x8xf32> to vector<2x8x1xf32>
    %36 = vector.broadcast %34 : vector<1x8x32xf32> to vector<2x8x32xf32>
    %37 = vector.broadcast %35 : vector<2x8x1xf32> to vector<2x8x32xf32>
    %38 = arith.mulf %36, %37 : vector<2x8x32xf32>
    %39 = arith.subf %31, %38 : vector<2x8x32xf32>
    %40 = arith.mulf %39, %39 : vector<2x8x32xf32>
    %cst_15 = arith.constant dense<0.000000e+00> : vector<2x8xf32>
    %41 = vector.multi_reduction <add>, %40, %cst_15 [2] : vector<2x8x32xf32> to vector<2x8xf32>
    %42 = vector.shape_cast %41 : vector<2x8xf32> to vector<2x8x1xf32>
    %cst_16 = arith.constant 1.000000e-24 : f32
    %43 = vector.broadcast %cst_16 : f32 to vector<2x8x1xf32>
    %44 = arith.maximumf %42, %43 : vector<2x8x1xf32>
    %45 = math.rsqrt %44 : vector<2x8x1xf32>
    %46 = vector.broadcast %45 : vector<2x8x1xf32> to vector<2x8x32xf32>
    %47 = arith.mulf %39, %46 : vector<2x8x32xf32>
    %48 = vector.shape_cast %47 : vector<2x8x32xf32> to vector<2x256xf32>
    %49 = arith.mulf %48, %48 : vector<2x256xf32>
    %cst_17 = arith.constant dense<0.000000e+00> : vector<2xf32>
    %50 = vector.multi_reduction <add>, %49, %cst_17 [1] : vector<2x256xf32> to vector<2xf32>
    %51 = vector.shape_cast %50 : vector<2xf32> to vector<2x1xf32>
    %cst_18 = arith.constant 1.000000e-24 : f32
    %52 = vector.broadcast %cst_18 : f32 to vector<2x1xf32>
    %53 = arith.maximumf %51, %52 : vector<2x1xf32>
    %54 = math.rsqrt %53 : vector<2x1xf32>
    %55 = vector.broadcast %54 : vector<2x1xf32> to vector<2x256xf32>
    %56 = arith.mulf %48, %55 : vector<2x256xf32>
    %c0_19 = arith.constant 0 : index
    %c0_20 = arith.constant 0 : index
    %57 = vector.load %arg5[%c0_19, %c0_20] : memref<2x256xf32, #tpu.memory_space<vmem>>, vector<2x256xf32>
    tpu.vector_store %arg5[%c0_19, %c0_20], %56 {strides = array<i32>} : memref<2x256xf32, #tpu.memory_space<vmem>>, vector<2x256xf32>,
    return
  }
  func.func @transform_0(%arg0: i32) -> (i32, i32, i32) {
    %c0_i32 = arith.constant 0 : i32
    %c0_i32_0 = arith.constant 0 : i32
    %c0_i32_1 = arith.constant 0 : i32
    return %arg0, %c0_i32, %c0_i32_0 : i32, i32, i32
  }
  func.func @transform_1(%arg0: i32) -> (i32, i32) {
    %c0_i32 = arith.constant 0 : i32
    %c0_i32_0 = arith.constant 0 : i32
    %c0_i32_1 = arith.constant 0 : i32
    return %c0_i32, %c0_i32_0 : i32, i32
  }
  func.func @transform_2(%arg0: i32) -> (i32, i32) {
    %c0_i32 = arith.constant 0 : i32
    %c0_i32_0 = arith.constant 0 : i32
    %c0_i32_1 = arith.constant 0 : i32
    return %c0_i32, %c0_i32_0 : i32, i32
  }
  func.func @transform_3(%arg0: i32) -> (i32, i32) {
    %c0_i32 = arith.constant 0 : i32
    %c0_i32_0 = arith.constant 0 : i32
    %c0_i32_1 = arith.constant 0 : i32
    return %c0_i32, %c0_i32_0 : i32, i32
  }
  func.func @transform_4(%arg0: i32) -> (i32, i32) {
    %c0_i32 = arith.constant 0 : i32
    %c0_i32_0 = arith.constant 0 : i32
    return %arg0, %c0_i32 : i32, i32
  }
}

</mosaic_0001>

<bundles_post_ra>
// kernel: netvlad_forward.1
= control target key start
LH: loop header
LB: loop body
LE: loop exit
PB: predicated region body
PF: predicated region fallthrough
CT: control target
= control target key end

     0   :  { %vm34_vm0 = vcmask 523264   ;;  %v756_v3 = vmov 0.0|0.0   ;;  %vm757_vm1 = vmmov 0   ;;  %v758_v15 = vmov 0.0   ;;  %s884_s0 = inlined_call_operand.vmem [shape: f32[2,32,64], index: 0, kind: input, shape index: {}]   ;;  %s885_s1 = inlined_call_operand.vmem [shape: f32[8,32], index: 1, kind: input, shape index: {}]   ;;  %s886_s2 = inlined_call_operand.vmem [shape: f32[8,1], index: 2, kind: input, shape index: {}]   ;;  %s887_s3 = inlined_call_operand.vmem [shape: f32[8,32], index: 3, kind: input, shape index: {}]   ;;  %s888_s4 = inlined_call_operand.hbm [shape: f32[2,256], index: 4, kind: output, shape index: {}]  }
   0x1   :  { %v18_v0 = vld [vmem:[%s884_s0] sm:$0xff]  ;;  %v19_v1 = vld [vmem:[%s884_s0 + $0x8] sm:$0xff]  ;;  %v20_v2 = vld [vmem:[%s884_s0 + $0x10] sm:$0xff]  ;;  %675 = vmatprep.subr.bf16.mxu0 %v756_v3  ;;  %681 = vmatprep.subr.bf16.mxu1 %v756_v3 }
   0x2   :  { %v21_v4 = vld [vmem:[%s884_s0 + $0x18] sm:$0xff]  ;;  %v26_v5 = vmul.f32 %v18_v0, %v18_v0  ;;  %v27_v6 = vmul.f32 %v19_v1, %v19_v1  ;;  %v28_v7 = vmul.f32 %v20_v2, %v20_v2  ;;  %v22_v8 = vld [vmem:[%s884_s0 + $0x20] sm:$0xff]  ;;  %v23_v9 = vld [vmem:[%s884_s0 + $0x28] sm:$0xff]  ;;  %639 = vmatprep.mubr.msk.f32.mxu0 %vm757_vm1, %v758_v15  ;;  %650 = vmatprep.mubr.msk.f32.mxu1 %vm757_vm1, %v758_v15 }
   0x3   :  { %v29_v10 = vmul.f32 %v21_v4, %v21_v4  ;;  %v24_v11 = vld [vmem:[%s884_s0 + $0x30] sm:$0xff]  ;;  %v25_v12 = vld [vmem:[%s884_s0 + $0x38] sm:$0xff]  ;;  %v30_v13 = vmul.f32 %v22_v8, %v22_v8  ;;  %v31_v14 = vmul.f32 %v23_v9, %v23_v9 }
   0x4   :  { %v35_v16 = vsel %vm34_vm0, %v26_v5, 0.0  ;;  %v36_v17 = vsel %vm34_vm0, %v27_v6, 0.0  ;;  %v38_v18 = vsel %vm34_vm0, %v28_v7, 0.0  ;;  %v32_v19 = vmul.f32 %v24_v11, %v24_v11 }
   0x5   :  { %9 = vsyncpa [#allocation3], 0  ;;  %v37_v20 = vadd.f32 %v36_v17, %v35_v16  ;;  %v33_v21 = vmul.f32 %v25_v12, %v25_v12  ;;  %v48_v22 = vsel %vm34_vm0, %v30_v13, 0.0  ;;  %v74_v23 = vld [vmem:[%s886_s2] sm:$0xff]  ;;  %v40_v24 = vsel %vm34_vm0, %v29_v10, 0.0  ;;  %s763_s8 = smov 32  }
   0x6   :  { %v49_v25 = vsel %vm34_vm0, %v31_v14, 0.0  ;;  %v51_v26 = vsel %vm34_vm0, %v32_v19, 0.0  ;;  %v759_v29 = vmov 0   ;;  %v73_v62 = vld [vmem:[%s885_s1] sm:$0xff]  ;;  %vm80_vm2 = vcmask 261120   ;;  %vm689_vm3 = vmpackc.low %vm34_vm0, %vm34_vm0  ;;  %s764_s9 = smov 96  }
   0x7   :  { %v39_v27 = vadd.f32 %v38_v18, %v37_v20  ;;  %v50_v28 = vadd.f32 %v49_v25, %v48_v22  ;;  %713 = vset.pattern.permute.xlu0 %v759_v29  ;;  %v53_v30 = vsel %vm34_vm0, %v33_v21, 0.0  ;;  %vm555_vm4 = vcmask 785408   ;;  %s765_s10 = smov [#allocation2]  }
   0x8   :  { %77 = vperm.xlu0 %713, %v74_v23   ;;  %vm562_vm5 = vcmask 1041408   ;;  %s590_s11 = sshll.u32 %s765_s10, 4  ;;  %s591_s11 = int_to_ptr.vmem [resolvable:$true] %s590_s11 }
   0x9   :  { %v41_v31 = vadd.f32 %v40_v24, %v39_v27  ;;  %v52_v32 = vadd.f32 %v51_v26, %v50_v28  ;;  %s732_s12 = scalar_lea.vmem %s591_s11, 64  ;;  %p737_p1 = scmp.lt.s32.totalorder %s591_s11, %s591_s11 }
   0xa   :  { %p733_p0 = scmp.ne.s32.totalorder %s591_s11, %s732_s12  ;;  %p738_p2 = scmp.lt.s32.totalorder %s732_s12, %s732_s12 }
   0xb   :  { %v42_v33 = vrot.slane %v41_v31, 4  ;;  %v54_v34 = vadd.f32 %v53_v30, %v52_v32 }
   0xc   :  { %p739_p3 = por %p738_p2, %p737_p1 }
   0xd   :  { %v43_v35 = vadd.f32 %v42_v33, %v41_v31  ;;  %v55_v36 = vrot.slane %v54_v34, 4 }
   0xe   :  { %p740_p4 = pnand %p739_p3, %p733_p0 }
   0xf   :  { %v44_v37 = vrot.slane %v43_v35, 2  ;;  %v56_v38 = vadd.f32 %v55_v36, %v54_v34 }
  0x11   :  { %v45_v39 = vadd.f32 %v44_v37, %v43_v35  ;;  %v57_v40 = vrot.slane %v56_v38, 2 }
  0x13   :  { %v46_v41 = vrot.slane %v45_v39, 1  ;;  %v58_v42 = vadd.f32 %v57_v40, %v56_v38 }
  0x15   :  { %v47_v43 = vadd.f32 %v46_v41, %v45_v39  ;;  %v59_v44 = vrot.slane %v58_v42, 1 }
  0x17   :  { %v61_v45 = vmax.f32 %v47_v43, 1e-24  ;;  %v60_v46 = vadd.f32 %v59_v44, %v58_v42 }
  0x19   :  { %714 = vrsqrt.f32 %v61_v45  ;;  %v62_v47 = vmax.f32 %v60_v46, 1e-24 }
  0x1b   :  { %716 = vrsqrt.f32 %v62_v47 }
  0x23   :  { %v715_v48 = vpop.eup %714 }
  0x24   :  { %v65_v49 = vmul.f32 %v715_v48, %v18_v0  ;;  %v66_v50 = vmul.f32 %v715_v48, %v19_v1  ;;  %v67_v51 = vmul.f32 %v715_v48, %v20_v2  ;;  %v68_v52 = vmul.f32 %v715_v48, %v21_v4 }
  0x25   :  { %v717_v53 = vpop.eup %716 }
  0x26   :  { %v676_v54 = vpack.c.bf16 %v66_v50, %v65_v49  ;;  %v69_v55 = vmul.f32 %v717_v53, %v22_v8  ;;  %v70_v56 = vmul.f32 %v717_v53, %v23_v9  ;;  %v71_v57 = vmul.f32 %v717_v53, %v24_v11 }
  0x27   :  { %v72_v58 = vmul.f32 %v717_v53, %v25_v12  ;;  %v679_v60 = vpack.c.bf16 %v68_v52, %v67_v51  ;;  %v444_v53 = vld [vmem:[%s887_s3] sm:$0xff]  ;;  %s762_s3 = smov 64  }
  0x28   :  { %677 = vmatpush3.bf16.msra.mxu0 %v676_v54  ;;  %v682_v59 = vpack.c.bf16 %v70_v56, %v69_v55 }
  0x29   :  { %678 = vmatprep.subr.bf16.mxu0 %v756_v3  ;;  %v685_v61 = vpack.c.bf16 %v72_v58, %v71_v57 }
  0x2a   :  { %683 = vmatpush3.bf16.msra.mxu1 %v682_v59 }
  0x2b   :  { %684 = vmatprep.subr.bf16.mxu1 %v756_v3 }
  0x2c   :  { %680 = vmatpush3.bf16.msra.mxu0 %v679_v60 }
  0x2d   :  { %687 = vmatprep.subr.bf16.mxu0 %v756_v3 }
  0x2e   :  { %686 = vmatpush3.bf16.msra.mxu1 %v685_v61 }
  0x2f   :  { %640 = vmatmul.mubr.msk.f32.vlgmr.msra.gmra.mrb[0].mxu0 %vm80_vm2, %v73_v62  ;;  %695 = vmatprep.subr.bf16.mxu1 %v756_v3 }
  0x30   :  { %661 = vmatprep.mubr.msk.f32.mxu0 %vm757_vm1, %v758_v15 }
  0x31   :  { %651 = vmatmul.mubr.msk.f32.vlgmr.msra.gmra.mrb[0].mxu1 %vm80_vm2, %v73_v62 }
  0x32   :  { %672 = vmatprep.mubr.msk.f32.mxu1 %vm757_vm1, %v758_v15 }
  0x35   :  { %690 = vmatpush3.bf16.xpose.msk.msra.mxu0 %vm689_vm3, %v676_v54 }
  0x36   :  { %691 = vmatprep.subr.bf16.mxu0 %v756_v3 }
  0x37   :  { %698 = vmatpush3.bf16.xpose.msk.msra.mxu1 %vm689_vm3, %v682_v59 }
  0x38   :  { %699 = vmatprep.subr.bf16.mxu1 %v756_v3 }
  0x3d   :  { %694 = vmatpush3.bf16.xpose.msk.msra.mxu0 %vm689_vm3, %v679_v60 }
  0x3f   :  { %702 = vmatpush3.bf16.xpose.msk.msra.mxu1 %vm689_vm3, %v685_v61 }
  0x87   :  { %v78_v63 = vpop.permute.xlu0 %77 }
 0x102   :  { %v150_v0 = vpop.f32.mrb[0].mxu0 }
 0x103   :  { %v151_v1 = vadd.f32 %v150_v0, %v78_v63  ;;  %v641_v2 = vpop.f32.mrb[1].mxu0 }
 0x104   :  { %v220_v4 = vpop.f32.mrb[0].mxu1 }
 0x105   :  { %v224_v5 = vsel %vm34_vm0, %v151_v1, -inf  ;;  %v221_v6 = vadd.f32 %v220_v4, %v78_v63  ;;  %v652_v7 = vpop.f32.mrb[1].mxu1 }
 0x106   :  { %v225_v8 = vrot.slane %v224_v5, 4 }
 0x107   :  { %v231_v9 = vsel %vm34_vm0, %v221_v6, -inf }
 0x108   :  { %v226_v10 = vmax.f32 %v224_v5, %v225_v8  ;;  %v232_v11 = vrot.slane %v231_v9, 4 }
 0x10a   :  { %v227_v12 = vrot.slane %v226_v10, 2  ;;  %v233_v13 = vmax.f32 %v231_v9, %v232_v11  ;;  %v760_v9 = vmov 1983009808   ;;  %v467_v11 = vlaneseq }
 0x10c   :  { %v228_v14 = vmax.f32 %v226_v10, %v227_v12  ;;  %v234_v3 = vrot.slane %v233_v13, 2  ;;  %v465_v10 = vunpack.c.l.s4 %v760_v9 }
 0x10e   :  { %v229_v16 = vrot.slane %v228_v14, 1  ;;  %v235_v17 = vmax.f32 %v233_v13, %v234_v3  ;;  %v466_v12 = vunpack.c.0.s8 %v465_v10  ;;  %v468_v13 = vshrl.u32 %v467_v11, 7 }
 0x110   :  { %v230_v18 = vmax.f32 %v228_v14, %v229_v16  ;;  %v236_v19 = vrot.slane %v235_v17, 1  ;;  %v761_v14 = vmov 1934713408  }
 0x111   :  { %v496_v3 = vunpack.c.l.s4 %v761_v14 }
 0x112   :  { %v238_v20 = vsub.f32 %v151_v1, %v230_v18  ;;  %v237_v21 = vmax.f32 %v235_v17, %v236_v19  ;;  %v469_v18 = vsub.s32 %v466_v12, %v468_v13 }
 0x113   :  { %v497_v19 = vunpack.c.0.s8 %v496_v3 }
 0x114   :  { %v240_v22 = vmul.f32 1.442695, %v238_v20  ;;  %v239_v23 = vsub.f32 %v221_v6, %v237_v21 }
 0x116   :  { %718 = vpow2.f32 %v240_v22  ;;  %v242_v24 = vmul.f32 1.442695, %v239_v23 }
 0x118   :  { %720 = vpow2.f32 %v242_v24 }
 0x120   :  { %v719_v25 = vpop.eup %718 }
 0x121   :  { %v244_v26 = vsel %vm34_vm0, %v719_v25, 0.0 }
 0x122   :  { %v721_v27 = vpop.eup %720  ;;  %v245_v28 = vrot.slane %v244_v26, 4 }
 0x123   :  { %v251_v29 = vsel %vm34_vm0, %v721_v27, 0.0 }
 0x124   :  { %v246_v30 = vadd.f32 %v245_v28, %v244_v26  ;;  %v252_v31 = vrot.slane %v251_v29, 4 }
 0x126   :  { %v247_v32 = vrot.slane %v246_v30, 2  ;;  %v253_v33 = vadd.f32 %v252_v31, %v251_v29 }
 0x128   :  { %v248_v34 = vadd.f32 %v247_v32, %v246_v30  ;;  %v254_v35 = vrot.slane %v253_v33, 2 }
 0x12a   :  { %v249_v36 = vrot.slane %v248_v34, 1  ;;  %v255_v37 = vadd.f32 %v254_v35, %v253_v33 }
 0x12c   :  { %v256_v38 = vrot.slane %v255_v37, 1  ;;  %v250_v39 = vadd.f32 %v249_v36, %v248_v34 }
 0x12e   :  { %722 = vrcp.f32 %v250_v39  ;;  %v257_v40 = vadd.f32 %v256_v38, %v255_v37 }
 0x130   :  { %724 = vrcp.f32 %v257_v40 }
 0x138   :  { %v723_v41 = vpop.eup %722 }
 0x139   :  { %v260_v42 = vmul.f32 %v723_v41, %v250_v39 }
 0x13a   :  { %v725_v43 = vpop.eup %724 }
 0x13b   :  { %v262_v44 = vsub.f32 2.0, %v260_v42  ;;  %v261_v45 = vmul.f32 %v725_v43, %v257_v40 }
 0x13d   :  { %v264_v46 = vmul.f32 %v723_v41, %v262_v44  ;;  %v263_v47 = vsub.f32 2.0, %v261_v45 }
 0x13f   :  { %v266_v48 = vmul.f32 %v719_v25, %v264_v46  ;;  %v265_v49 = vmul.f32 %v725_v43, %v263_v47  ;;  %v500_v25 = vsub.s32 %v497_v19, %v468_v13 }
 0x141   :  { %662 = vmatmul.mubr.msk.f32.vlgmr.msra.gmra.mrb[2].mxu0 %vm34_vm0, %v266_v48  ;;  %v267_v50 = vmul.f32 %v721_v27, %v265_v49  ;;  %v438_v51 = vsel %vm34_vm0, %v266_v48, 0.0 }
 0x142   :  { %439 = vadd.xlane.f32.xlu0 %v438_v51 }
 0x143   :  { %673 = vmatmul.mubr.msk.f32.vlgmr.msra.gmra.mrb[2].mxu1 %vm34_vm0, %v267_v50  ;;  %v441_v52 = vsel %vm34_vm0, %v267_v50, 0.0 }
 0x144   :  { %442 = vadd.xlane.f32.xlu1 %v441_v52 }
 0x1cf   :  { %v440_v54 = vpop.xlane.xlu0 %439 }
 0x1d0   :  { %v445_v56 = vmul.f32 %v444_v53, %v440_v54 }
 0x1d1   :  { %v443_v55 = vpop.xlane.xlu1 %442 }
 0x1d2   :  { %v446_v58 = vmul.f32 %v444_v53, %v443_v55 }
 0x214   :  { %v349_v57 = vpop.f32.mrb[2].mxu0 }
 0x215   :  { %v447_v59 = vsub.f32 %v349_v57, %v445_v56  ;;  %v663_v60 = vpop.f32.mrb[3].mxu0 }
 0x216   :  { %v434_v61 = vpop.f32.mrb[2].mxu1 }
 0x217   :  { %v448_v62 = vsub.f32 %v434_v61, %v446_v58  ;;  %v674_v63 = vpop.f32.mrb[3].mxu1  ;;  %v449_v0 = vmul.f32 %v447_v59, %v447_v59 }
 0x219   :  { %v451_v1 = vsel %vm80_vm2, %v449_v0, 0.0  ;;  %v450_v2 = vmul.f32 %v448_v62, %v448_v62 }
 0x21a   :  { %452 = vadd.xlane.f32.xlu1 %v451_v1 }
 0x21b   :  { %v454_v4 = vsel %vm80_vm2, %v450_v2, 0.0 }
 0x21e   :  { %455 = vadd.xlane.f32.xlu1 %v454_v4 }
 0x2a7   :  { %v453_v5 = vpop.xlane.xlu1 %452 }
 0x2a8   :  { %v457_v6 = vmax.f32 %v453_v5, 1e-24 }
 0x2aa   :  { %726 = vrsqrt.f32 %v457_v6 }
 0x2ab   :  { %v456_v7 = vpop.xlane.xlu1 %455 }
 0x2ac   :  { %v458_v8 = vmax.f32 %v456_v7, 1e-24 }
 0x2ae   :  { %728 = vrsqrt.f32 %v458_v8 }
 0x2b4   :  { %v727_v16 = vpop.eup %726 }
 0x2b5   :  { %v461_v17 = vmul.f32 %v727_v16, %v447_v59 }
 0x2b7   :  { %v463_v22 = vcombine.high %v461_v17, %v758_v15  ;;  %v470_v23 = vrot.slane %v461_v17, %v469_v18 }
 0x2b8   :  { %v729_v20 = vpop.eup %728 }
 0x2b9   :  { %v462_v21 = vmul.f32 %v729_v20, %v448_v62  ;;  %v477_v28 = vrot.slane %v463_v22, %v469_v18 }
 0x2bb   :  { %v485_v24 = vrot.slane %v462_v21, %v469_v18  ;;  %v478_v26 = vcombine.high %v462_v21, %v758_v15 }
 0x2bd   :  { %v494_v27 = vcombine.high %v470_v23, %v485_v24  ;;  %v492_v29 = vrot.slane %v478_v26, %v469_v18  ;;  %v493_v30 = vcombine.low %v470_v23, %v485_v24 }
 0x2bf   :  { %v508_v31 = vrot.slane %v494_v27, %v500_v25  ;;  %v510_v32 = vcombine.high %v477_v28, %v492_v29  ;;  %v501_v33 = vrot.slane %v493_v30, %v500_v25  ;;  %v509_v36 = vcombine.low %v477_v28, %v492_v29 }
 0x2c1   :  { %534 = vrot.lane.b32.xlu1 %v508_v31, %s762_s3  ;;  %v524_v34 = vrot.slane %v510_v32, %v500_v25  ;;  %v525_v35 = vcombine.high %v501_v33, %v758_v15  ;;  %v526_v37 = vcombine.high %v508_v31, %v758_v15  ;;  %v517_v38 = vrot.slane %v509_v36, %v500_v25 }
 0x2c3   :  { %546 = vrot.lane.b32.xlu0 %v524_v34, %s762_s3  ;;  %v527_v39 = vcombine.high %v517_v38, %v758_v15  ;;  %v528_v40 = vcombine.high %v524_v34, %v758_v15 }
 0x2c5   :  { %530 = vrot.lane.b32.xlu1 %v525_v35, %s763_s8 }
 0x2c9   :  { %538 = vrot.lane.b32.xlu1 %v526_v37, %s764_s9 }
 0x2cd   :  { %542 = vrot.lane.b32.xlu1 %v527_v39, %s763_s8 }
 0x2d1   :  { %550 = vrot.lane.b32.xlu1 %v528_v40, %s764_s9 }
 0x333   :  { %v535_v41 = vpop.permute.xlu1 %534 }
 0x335   :  { %v547_v49 = vpop.permute.xlu0 %546 }
 0x337   :  { %v531_v42 = vpop.permute.xlu1 %530 }
 0x338   :  { %v553_v44 = vsel %vm80_vm2, %v501_v33, %v531_v42 }
 0x339   :  { %v554_v45 = vsel %vm34_vm0, %v553_v44, %v535_v41 }
 0x33b   :  { %v539_v43 = vpop.permute.xlu1 %538 }
 0x33c   :  { %v556_v47 = vsel %vm555_vm4, %v554_v45, %v539_v43 }
 0x33d   :  { %v560_v50 = vmul.f32 %v556_v47, %v556_v47 }
 0x33f   :  { %v543_v46 = vpop.permute.xlu1 %542  ;;  %v563_v54 = vsel %vm562_vm5, %v560_v50, 0.0 }
 0x340   :  { %v557_v48 = vsel %vm80_vm2, %v517_v38, %v543_v46 }
 0x341   :  { %v558_v51 = vsel %vm34_vm0, %v557_v48, %v547_v49 }
 0x343   :  { %v551_v52 = vpop.permute.xlu1 %550 }
 0x344   :  { %v559_v53 = vsel %vm555_vm4, %v558_v51, %v551_v52 }
 0x345   :  { %v561_v15 = vmul.f32 %v559_v53, %v559_v53 }
 0x347   :  { %v564_v55 = vsel %vm562_vm5, %v561_v15, 0.0 }
 0x348   :  { %v565_v56 = vadd.f32 %v564_v55, %v563_v54 }
 0x34a   :  { %566 = vadd.xlane.f32.xlu1 %v565_v56 }
 0x3d7   :  { %v567_v57 = vpop.xlane.xlu1 %566 }
 0x3d8   :  { %v568_v58 = vmax.f32 %v567_v57, 1e-24 }
 0x3da   :  { %730 = vrsqrt.f32 %v568_v58 }
 0x3e4   :  { %v731_v59 = vpop.eup %730 }
 0x3e5   :  { %v570_v60 = vmul.f32 %v731_v59, %v556_v47  ;;  %v571_v61 = vmul.f32 %v731_v59, %v559_v53 }
 0x3e7   :  { %v574_v62 = vcombine.low %v570_v60, %v571_v61 }
 0x3e9   :  { %610 = vst.sshfl [vmem:[#allocation2] sm:$0x33 pattern:$0x76325410] %v574_v62 }
 0x3ea   :  { %743 = shalt.err (!%p740_p4)
}
 0x3eb   :  { %s744_s15 = scalar_lea.hbm %s888_s4, 64 }
 0x3ec   :  { %p745_p5 = scmp.ne.s32.totalorder %s888_s4, %s744_s15  ;;  %p748_p6 = scmp.lt.u32.totalorder %s744_s15, %s888_s4 }
 0x3ee   :  { %p750_p7 = pnand %p748_p6, %p745_p5 }
 0x3f0   :  { %753 = shalt.err (!%p750_p7)
}
 0x3f1   :  { %593 = dma.vmem_to_hbm [thread:$0]  %s591_s11, 64, %s888_s4, [#allocation3]  }
 0x3f2   :  { %754 = dma.done.wait [#allocation3], 64  }
 0x3f3   :  { %755 = vsyncadd [#allocation3], 4294967232 }
 0x3f4   :  { %597 = vsyncpa [#allocation3], 1 }

</bundles_post_ra>
